<compile_context>
chip_gen: v6e
topology: v6e:2x2x1
jax: 0.10.0
libtpu: 0.0.40
codegen_flags: <defaults>
</compile_context>

<pallas_src>
import math

import numpy as np
import jax
import jax.numpy as jnp
from jax import lax
from jax.experimental import pallas as pl
from jax.experimental.pallas import tpu as pltpu


def _round_up(x, m):
    return ((x + m - 1) // m) * m


def _sinpos_kernel(idx_ref, s_ref, out_ref):
    # idx_ref: (TR, K) f32 -- K = G packed position columns + ones column (+ zero pad)
    # s_ref:   (K, W)  f32 -- block-diagonal div_term selection; row G = phase (0 / pi/2)
    # out_ref: (TR, W)     -- W = G*d_model, multiple of 128 (unmasked stores)
    ang = jnp.dot(idx_ref[...], s_ref[...],
                  precision=lax.Precision.HIGHEST,        # keep indices at f32 on the MXU
                  preferred_element_type=jnp.float32)
    out_ref[...] = jnp.sin(ang).astype(out_ref.dtype)     # cos folded in via +pi/2 phase


def sinusoidal_positional_embedding(emb_indices, d_model, *, out_dtype=jnp.float32):
    """emb_indices: array of arbitrary shape (*). Returns (*, d_model)."""
    if d_model % 2 != 0:
        raise ValueError(f"Sinusoidal positional encoding with odd d_model: {d_model}")

    input_shape = emb_indices.shape
    flat = jnp.reshape(emb_indices, (-1,)).astype(jnp.float32)
    n = flat.shape[0]
    D = d_model

    # Pack G consecutive positions per kernel row so the output minor dim
    # W = G*D is a multiple of 128 (lane dense).  G == 1 when D % 128 == 0.
    G = 128 // math.gcd(D, 128)
    W = G * D
    K = _round_up(G + 1, 8)   # G position columns + 1 "ones" column, padded to sublane=8

    # Host-side constant S_aug (tiny, resident in VMEM):
    #   S_aug[g, g*D + d] = div_term[d//2]          (g < G)
    #   S_aug[G, :]       = phase (0 for sin cols, pi/2 for cos cols)
    half = np.arange(0, D, 2, dtype=np.float32)
    div_term = np.exp(half * (-math.log(10000.0) / D)).astype(np.float32)     # (D/2,)
    div_col = np.repeat(div_term, 2)                                          # (D,)
    phase_col = np.tile(np.array([0.0, math.pi / 2.0], np.float32), D // 2)   # (D,)
    s_aug = np.zeros((K, W), dtype=np.float32)
    for g in range(G):
        s_aug[g, g * D:(g + 1) * D] = div_col
    s_aug[G, :] = np.tile(phase_col, G)

    # Minimal input-side pad so n is a multiple of G (<= G-1 elements).
    n_pad = _round_up(n, G)
    rows = n_pad // G
    if n_pad != n:
        flat = jnp.pad(flat, (0, n_pad - n))

    # idx_aug[r, g] = flat[r*G + g]  (no transpose needed), column G is 1.0 for
    # the phase row of S_aug, remaining columns are zero padding.
    idx_mat = flat.reshape(rows, G)
    parts = [idx_mat, jnp.ones((rows, 1), jnp.float32)]
    if K > G + 1:
        parts.append(jnp.zeros((rows, K - G - 1), jnp.float32))
    idx_aug = jnp.concatenate(parts, axis=1)                                  # (rows, K)

    # Row tile from a ~24 MiB double-buffered block budget.  Per row of VMEM:
    # out block W*4 B; idx block lane-pads K -> 128 lanes, i.e. 512 B.
    vmem_block_budget = 24 * 1024 * 1024
    bytes_per_row = (W + 128) * 4
    tr_cap = max(8, (vmem_block_budget // (2 * bytes_per_row)) // 8 * 8)
    if rows < 16:
        tr = rows                      # single full-array block (always legal)
    else:
        steps = max(2, pl.cdiv(rows, tr_cap))   # >=2 steps: keep both v7x TCs busy
        if steps % 2:
            steps += 1                          # even split across the 2 TensorCores
        tr = min(tr_cap, _round_up(pl.cdiv(rows, steps), 8))
    grid = (pl.cdiv(rows, tr),)

    out = pl.pallas_call(
        _sinpos_kernel,
        out_shape=jax.ShapeDtypeStruct((rows, W), out_dtype),
        grid=grid,
        in_specs=[
            pl.BlockSpec((tr, K), lambda i: (i, 0)),
            pl.BlockSpec((K, W), lambda i: (0, 0)),
        ],
        out_specs=pl.BlockSpec((tr, W), lambda i: (i, 0)),
        compiler_params=pltpu.CompilerParams(
            dimension_semantics=("parallel",),
            vmem_limit_bytes=48 * 1024 * 1024,
        ),
    )(idx_aug, jnp.asarray(s_aug))

    out = jnp.reshape(out, (n_pad, D))     # free: same row-major element order
    if n_pad != n:
        out = out[:n]                      # only when n % G != 0
    return jnp.reshape(out, (*input_shape, D))


def _reference(emb_indices, d_model):
    half = np.arange(0, d_model, 2, dtype=np.float32)
    div_term = jnp.asarray(np.exp(half * (-math.log(10000.0) / d_model)))
    omegas = jnp.reshape(emb_indices.astype(jnp.float32), (-1, 1, 1)) * \
             jnp.reshape(div_term, (1, -1, 1))
    emb = jnp.concatenate([jnp.sin(omegas), jnp.cos(omegas)], axis=2)
    return jnp.reshape(emb, (*emb_indices.shape, d_model))


if __name__ == "__main__":
    d_model = 32
    key = jax.random.PRNGKey(0)
    # arbitrary-shaped positional indices (e.g. pairwise distances / positions)
    emb_indices = jax.random.uniform(key, (2, 8, 16), dtype=jnp.float32) * 100.0

    out = sinusoidal_positional_embedding(emb_indices, d_model)
    out = jax.block_until_ready(out)

    ref = _reference(emb_indices, d_model)
    assert out.shape == (2, 8, 16, d_model)
    # cos(x) = sin(x + pi/2) plus the f32 MXU angle construction introduce a
    # few-ulp-of-|x| error in the angle; for |x| <= ~100 this stays well below
    # 1e-4 in the embedding values.
    assert jnp.allclose(out, ref, atol=1e-4, rtol=1e-5)
    print("KERNEL_OK")
</pallas_src>

<mosaic_0001>
module attributes {stable_mosaic.version = 11 : i64} {
  func.func @_sinpos_kernel(%arg0: i32, %arg1: memref<32x8xf32, #tpu.memory_space<vmem>>, %arg2: memref<8x128xf32, #tpu.memory_space<vmem>>, %arg3: memref<32x128xf32, #tpu.memory_space<vmem>>) attributes {dimension_semantics = [#tpu.dimension_semantics<parallel>], iteration_bounds = array<i64: 2>, scalar_prefetch = 0 : i64, scratch_operands = 0 : i64, tpu.core_type = #tpu.core_type<tc>, window_params = [{transform_indices = @transform_0, window_bounds = array<i64: 32, 8>}, {pipeline_mode = #tpu.pipeline_mode<synchronous>, transform_indices = @transform_1, window_bounds = array<i64: 8, 128>}, {transform_indices = @transform_2, window_bounds = array<i64: 32, 128>}]} {
    %c0 = arith.constant 0 : index
    %c0_0 = arith.constant 0 : index
    %0 = vector.load %arg1[%c0, %c0_0] : memref<32x8xf32, #tpu.memory_space<vmem>>, vector<32x8xf32>
    %c0_1 = arith.constant 0 : index
    %c0_2 = arith.constant 0 : index
    %1 = vector.load %arg2[%c0_1, %c0_2] : memref<8x128xf32, #tpu.memory_space<vmem>>, vector<8x128xf32>
    %cst = arith.constant dense<0.000000e+00> : vector<32x128xf32>
    %2 = tpu.matmul %0, %1, %cst {dimension_numbers = #tpu.dot_dimension_numbers<[1], [0], [0], [1], [0, 0, 1, 1], [], []>, precision = #tpu.contract_precision<fp32>} : vector<32x8xf32>, vector<8x128xf32>, vector<32x128xf32> -> vector<32x128xf32>
    %3 = math.sin %2 : vector<32x128xf32>
    %c0_3 = arith.constant 0 : index
    %c0_4 = arith.constant 0 : index
    %4 = vector.load %arg3[%c0_3, %c0_4] : memref<32x128xf32, #tpu.memory_space<vmem>>, vector<32x128xf32>
    tpu.vector_store %arg3[%c0_3, %c0_4], %3 {strides = array<i32>} : memref<32x128xf32, #tpu.memory_space<vmem>>, vector<32x128xf32>,
    return
  }
  func.func @transform_0(%arg0: i32) -> (i32, i32) {
    %c0_i32 = arith.constant 0 : i32
    %c0_i32_0 = arith.constant 0 : i32
    return %arg0, %c0_i32 : i32, i32
  }
  func.func @transform_1(%arg0: i32) -> (i32, i32) {
    %c0_i32 = arith.constant 0 : i32
    %c0_i32_0 = arith.constant 0 : i32
    %c0_i32_1 = arith.constant 0 : i32
    return %c0_i32, %c0_i32_0 : i32, i32
  }
  func.func @transform_2(%arg0: i32) -> (i32, i32) {
    %c0_i32 = arith.constant 0 : i32
    %c0_i32_0 = arith.constant 0 : i32
    return %arg0, %c0_i32 : i32, i32
  }
}

</mosaic_0001>

<bundles_post_ra>
// kernel: tpu_custom_call.1
= control target key start
LH: loop header
LB: loop body
LE: loop exit
PB: predicated region body
PF: predicated region fallthrough
CT: control target
= control target key end

     0   :  { %7 = vsyncpa [#allocation3], 0  ;;  %s1888_s0 = inlined_call_operand.vmem [shape: f32[64,8], index: 0, kind: input, shape index: {}]   ;;  %s1889_s1 = inlined_call_operand.vmem [shape: f32[8,128], index: 1, kind: input, shape index: {}]   ;;  %s1890_s2 = inlined_call_operand.hbm [shape: f32[64,128], index: 2, kind: output, shape index: {}]  }
   0x1   :  { %9 = vsyncpa [#allocation3 + $0x1], 0  ;;  %s1506_s9 = smov 0   ;;  %s1508_s10 = smov 0  }
   0x2   :  { %s1510_s11 = smov 0   ;;  %s1512_s12 = smov 0  }
   0x3 LB: > { %s1527_s13 = sadd.s32 4294967295, %s1480_s12   ;;  %s1234_s14 = sadd.s32 4294967294, %s1480_s12   ;;  %s1480_s12 = sphi %s1512_s12, %s1900_s12   ;;  %s1476_s11 = sphi %s1510_s11, %s1899_s11   ;;  %s1472_s10 = sphi %s1508_s10, %s1898_s10   ;;  %s1468_s9 = sphi %s1506_s9, %s1897_s9  }
   0x4   : > { %s1531_s15 = sadd.s32 1, %s1480_s12   ;;  %s69_s16 = sadd.s32 1, %s1476_s11 }
   0x5   : > { %s66_s17 = ssub.s32 %s1480_s12, %s1531_s15  ;;  %p79_p0 = scmp.ne.s32.totalorder %s1476_s11, %s1472_s10 }
   0x6   : > { %p67_p1 = scmp.eq.s32.totalorder %s66_s17, 0  ;;  %p80_p2 = scmp.eq.s32.totalorder %s1527_s13, 1 }
   0x7   : > { %p85_p3 = scmp.ne.s32.totalorder %s1472_s10, %s1468_s9  ;;  %p86_p4 = scmp.eq.s32.totalorder %s1234_s14, 1 }
   0x8   : > { %s1542_s18 = scalar_select %p67_p1, %s1476_s11, %s69_s16  }
   0x9   : > { %p1544_p5 = por %p80_p2, %p79_p0  ;;  %p1548_p6 = por %p86_p4, %p85_p3 }
   0xa   : > { %p1237_p7 = scmp.ge.s32.totalorder %s1480_s12, 1  ;;  %p116_p8 = scmp.lt.s32.totalorder %s1480_s12, 3 }
   0xc   : > { %p117_p9 = pnand %p1237_p7, %p116_p8 }
   0xd   : > { %s1239_s23 = sshll.u32 (!%p117_p9), %s1527_s13, 2  ;;  %s135_s28 = sand.u32 (!%p117_p9), 1, %s1472_s10  }
   0xe   : > { %120 = sbr.rel (%p117_p9) target bundleno = 402 (0x192), region = 28  ;;  %p139_p10 = scmp.lt.s32.totalorder (!%p117_p9), %s1239_s23, 7 }
   0xf   : > { %s1238_s29 = sshll.u32 (!%p117_p9), %s135_s28, 5  ;;  %s1262_s3 = sshll.u32 (!%p117_p9), %s1527_s13, 9 }
  0x10   : > { %s1813_s30 = scalar_lea.vmem (!%p117_p9), [#allocation2], %s1238_s29  ;;  %s1840_s7 = scalar_lea.hbm (!%p117_p9), %s1890_s2, %s1262_s3 }
  0x11   : > { %s1172_s4 = sshll.u32 (!%p117_p9), %s1813_s30, 4  ;;  %s1848_s8 = scalar_lea.sflag (!%p117_p9), [#allocation3], %s135_s28  ;;  %s1842_s4 = int_to_ptr.vmem [resolvable:$true] %s1172_s4 }
  0x12   : > { %s1420_s13 = scalar_lea.vmem (!%p117_p9), %s1842_s4, 512  ;;  %s1488_s14 = smov (!%p117_p9), [#allocation2]  }
  0x13   : > { %v149_v0 = vld [vmem:[%s1889_s1] sm:$0xff]  ;;  %s1902_s23 = smov (!%p139_p10, %s1239_s23), 7  ;;  %vm150_vm0 = vcmask 64512   ;;  %p1421_p11 = scmp.ne.s32.totalorder %s1842_s4, %s1420_s13 }
  0x14   : > { %v194_v1 = vand.u32 4294901760, %v149_v0  ;;  %s1240_s24 = sshll.u32 %s1902_s23, 3  ;;  %s1424_s16 = sshll.u32 %s1488_s14, 4  ;;  %s1425_s16 = int_to_ptr.vmem [resolvable:$false] %s1424_s16 }
  0x15   : > { %s142_s27 = scalar_lea.vmem %s1888_s0, %s1240_s24  ;;  %p1422_p12 = pnand %p1421_p11, %p1544_p5 }
  0x16   : > { %1293 = vmatprep.subr.mxu0 %v194_v1  ;;  %v301_v2 = vsub.f32 %v149_v0, %v194_v1  ;;  %v145_v5 = vld [vmem:[%s142_s27] sm:$0xff]  ;;  %v146_v6 = vld [vmem:[%s142_s27 + $0x8] sm:$0xff]  ;;  %v147_v7 = vld [vmem:[%s142_s27 + $0x10] sm:$0xff]  ;;  %s1426_s17 = scalar_lea.vmem %s1425_s16, 1024  ;;  %p1427_p0 = scmp.lt.s32.totalorder %s1842_s4, %s1425_s16 }
  0x17   : > { %1294 = vmatpush3.msra.mxu0 %v194_v1  ;;  %v152_v8 = vsel %vm150_vm0, %v145_v5, 0  ;;  %v155_v9 = vsel %vm150_vm0, %v146_v6, 0  ;;  %v158_v10 = vsel %vm150_vm0, %v147_v7, 0  ;;  %v148_v11 = vld [vmem:[%s142_s27 + $0x18] sm:$0xff]  ;;  %p1423_p13 = pneg %p1422_p12  ;;  %p1428_p1 = scmp.lt.s32.totalorder %s1426_s17, %s1420_s13 }
  0x18   : > { %v302_v3 = vand.u32 4294901760, %v301_v2  ;;  %1309 = vmatprep.subr.mxu0 %v301_v2  ;;  %v229_v13 = vand.u32 4294901760, %v152_v8  ;;  %v239_v14 = vand.u32 4294901760, %v155_v9  ;;  %v249_v15 = vand.u32 4294901760, %v158_v10 }
  0x19   : > { %v161_v16 = vsel %vm150_vm0, %v148_v11, 0  ;;  %p1429_p2 = por %p1428_p1, %p1427_p0 }
  0x1a   : > { %v303_v4 = vsub.f32 %v301_v2, %v302_v3  ;;  %v230_v17 = vsub.f32 %v152_v8, %v229_v13  ;;  %1303 = vmatprep.mubr.f32.mxu1 %v229_v13  ;;  %v240_v18 = vsub.f32 %v155_v9, %v239_v14  ;;  %v250_v19 = vsub.f32 %v158_v10, %v249_v15 }
  0x1b   : > { %v259_v20 = vand.u32 4294901760, %v161_v16  ;;  %p1430_p3 = pnand %p1429_p2, %p1423_p13 }
  0x1c   : > { %v304_v12 = vand.u32 4294901760, %v303_v4  ;;  %v231_v21 = vand.u32 4294901760, %v230_v17  ;;  %v241_v22 = vand.u32 4294901760, %v240_v18  ;;  %v251_v23 = vand.u32 4294901760, %v250_v19 }
  0x1d   : > { %v260_v24 = vsub.f32 %v161_v16, %v259_v20 }
  0x1e   : > { %1301 = vmatprep.subr.mxu1 %v304_v12  ;;  %v232_v25 = vsub.f32 %v230_v17, %v231_v21  ;;  %v242_v26 = vsub.f32 %v240_v18, %v241_v22  ;;  %v252_v27 = vsub.f32 %v250_v19, %v251_v23 }
  0x1f   : > { %1302 = vmatpush3.msra.mxu1 %v304_v12  ;;  %v261_v28 = vand.u32 4294901760, %v260_v24 }
  0x20   : > { %1304 = vmatmul.mubr.f32.vlgmr.msra.gmra.mxu1 %v239_v14  ;;  %1317 = vmatprep.subr.mxu1 %v194_v1  ;;  %v233_v29 = vand.u32 4294901760, %v232_v25  ;;  %v243_v30 = vand.u32 4294901760, %v242_v26  ;;  %v253_v31 = vand.u32 4294901760, %v252_v27 }
  0x21   : > { %1318 = vmatpush3.msra.mxu1 %v194_v1  ;;  %1306 = vmatprep.mubr.f32.mxu1 %v249_v15  ;;  %v262_v32 = vsub.f32 %v260_v24, %v261_v28 }
  0x22   : > { %1333 = vmatprep.subr.mxu1 %v194_v1  ;;  %1295 = vmatprep.mubr.f32.mxu0 %v233_v29 }
  0x23   : > { %1296 = vmatmul.mubr.f32.vlgmr.msra.gmra.mxu0 %v243_v30  ;;  %v263_v33 = vand.u32 4294901760, %v262_v32 }
  0x24   : > { %1307 = vmatmul.mubr.f32.gmra.mxu1 %v259_v20  ;;  %1310 = vmatpush3.msra.mxu0 %v301_v2 }
  0x25   : > { %1319 = vmatprep.mubr.f32.mxu1 %v231_v21  ;;  %1298 = vmatprep.mubr.f32.mxu0 %v253_v31 }
  0x26   : > { %1325 = vmatprep.subr.mxu0 %v302_v3 }
  0x27   : > { %1299 = vmatmul.mubr.f32.gmra.mxu0 %v263_v33 }
  0x28   : > { %1320 = vmatmul.mubr.f32.vlgmr.msra.gmra.mxu1 %v241_v22  ;;  %1311 = vmatprep.mubr.f32.mxu0 %v230_v17 }
  0x29   : > { %1334 = vmatpush3.msra.mxu1 %v194_v1  ;;  %1322 = vmatprep.mubr.f32.mxu1 %v251_v23 }
  0x2b   : > { %1312 = vmatmul.mubr.f32.vlgmr.msra.gmra.mxu0 %v240_v18 }
  0x2c   : > { %1323 = vmatmul.mubr.f32.gmra.mxu1 %v261_v28  ;;  %1326 = vmatpush3.msra.mxu0 %v302_v3 }
  0x2d   : > { %1335 = vmatprep.mubr.f32.mxu1 %v229_v13  ;;  %1314 = vmatprep.mubr.f32.mxu0 %v250_v19 }
  0x2f   : > { %1315 = vmatmul.mubr.f32.gmra.mxu0 %v260_v24 }
  0x30   : > { %1336 = vmatmul.mubr.f32.vlgmr.msra.gmra.mxu1 %v239_v14  ;;  %1327 = vmatprep.mubr.f32.mxu0 %v229_v13 }
  0x31   : > { %1338 = vmatprep.mubr.f32.mxu1 %v249_v15 }
  0x33   : > { %1328 = vmatmul.mubr.f32.vlgmr.msra.gmra.mxu0 %v239_v14 }
  0x34   : > { %1339 = vmatmul.mubr.f32.gmra.mxu1 %v259_v20  ;;  %1330 = vmatprep.mubr.f32.mxu0 %v249_v15 }
  0x37   : > { %1331 = vmatmul.mubr.f32.gmra.mxu0 %v259_v20 }
  0xe0   : > { %v1305_v34 = vpop.f32.mrf.mxu1 }
  0xe2   : > { %v341_v35 = vpop.f32.mrf.mxu1 }
  0xe3   : > { %v1297_v38 = vpop.f32.mrf.mxu0 }
  0xe4   : > { %v1308_v36 = vpop.f32.mrf.mxu1  ;;  %v348_v46 = vadd.f32 %v1305_v34, %v1297_v38  ;;  %v1482_v34 = vmov 683565275   ;;  %v1484_v38 = vmov 2131351028  }
  0xe5   : > { %v235_v39 = vpop.f32.mrf.mxu0 }
  0xe6   : > { %v353_v37 = vpop.f32.mrf.mxu1  ;;  %v342_v48 = vadd.f32 %v341_v35, %v235_v39 }
  0xe7   : > { %v1300_v41 = vpop.f32.mrf.mxu0 }
  0xe8   : > { %v1321_v40 = vpop.f32.mrf.mxu1  ;;  %v360_v53 = vadd.f32 %v1308_v36, %v1300_v41  ;;  %v1483_v36 = vmov 2475754826  }
  0xe9   : > { %v255_v43 = vpop.f32.mrf.mxu0 }
  0xea   : > { %v528_v42 = vpop.f32.mrf.mxu1  ;;  %v354_v8 = vadd.f32 %v353_v37, %v255_v43 }
  0xeb   : > { %v1313_v44 = vpop.f32.mrf.mxu0 }
  0xec   : > { %v1324_v45 = vpop.f32.mrf.mxu1  ;;  %v441_v49 = vadd.f32 %v1313_v44, %v348_v46 }
  0xed   : > { %v433_v47 = vpop.f32.mrf.mxu0 }
  0xee   : > { %v544_v51 = vpop.f32.mrf.mxu1  ;;  %v434_v52 = vadd.f32 %v433_v47, %v342_v48  ;;  %v537_v55 = vadd.f32 %v1321_v40, %v441_v49  ;;  %v1485_v40 = vmov 2102212464   ;;  %v1487_v49 = vmov 1326507024  }
  0xef   : > { %v1316_v50 = vpop.f32.mrf.mxu0 }
  0xf0   : > { %v455_v56 = vadd.f32 %v1316_v50, %v360_v53  ;;  %v1337_v58 = vpop.f32.mrf.mxu1  ;;  %v529_v59 = vadd.f32 %v528_v42, %v434_v52  ;;  %v1486_v42 = vmov 920167782  }
  0xf1   : > { %v447_v54 = vpop.f32.mrf.mxu0 }
  0xf2   : > { %v553_v0 = vadd.f32 %v1324_v45, %v455_v56  ;;  %v716_v1 = vpop.f32.mrf.mxu1  ;;  %v448_v15 = vadd.f32 %v447_v54, %v354_v8 }
  0xf3   : > { %v1329_v57 = vpop.f32.mrf.mxu0 }
  0xf4   : > { %v633_v60 = vadd.f32 %v1329_v57, %v537_v55  ;;  %v1340_v12 = vpop.f32.mrf.mxu1  ;;  %v545_v24 = vadd.f32 %v544_v51, %v448_v15 }
  0xf5   : > { %v626_v61 = vpop.f32.mrf.mxu0 }
  0xf6   : > { %v1561_v62 = vadd.f32 %v1337_v58, %v633_v60  ;;  %v627_v63 = vadd.f32 %v626_v61, %v529_v59 }
  0xf7   : > { %v1332_v2 = vpop.f32.mrf.mxu0 }
  0xf8   : > { %v842_v3 = vand.u32 2147483647, %v1561_v62  ;;  %v845_v4 = vand.u32 2139095040, %v1561_v62  ;;  %v1565_v5 = vadd.f32 %v716_v1, %v627_v63  ;;  %v645_v6 = vadd.f32 %v1332_v2, %v553_v0 }
  0xf9   : > { %v638_v23 = vpop.f32.mrf.mxu0 }
  0xfa   : > { %v846_v7 = vshrl.u32 %v845_v4, 23  ;;  %v849_v9 = vand.u32 8388607, %v842_v3  ;;  %v738_v10 = vand.u32 2147483647, %v1565_v5  ;;  %v741_v11 = vand.u32 2139095040, %v1565_v5 }
  0xfb   : > { %v1571_v14 = vadd.f32 %v1340_v12, %v645_v6  ;;  %v1580_v32 = vadd.f32 %v638_v23, %v545_v24 }
  0xfc   : > { %v1245_v13 = vadd.s32 4294967169, %v846_v7  ;;  %v742_v16 = vshrl.u32 %v741_v11, 23  ;;  %v745_v17 = vand.u32 8388607, %v738_v10  ;;  %v850_v19 = vor.u32 8388608, %v849_v9 }
  0xfd   : > { %v1053_v22 = vand.u32 2139095040, %v1571_v14 }
  0xfe   : > { %v852_v18 = vadd.s32 1, %v1245_v13  ;;  %v1241_v20 = vadd.s32 4294967169, %v742_v16  ;;  %v746_v21 = vor.u32 8388608, %v745_v17  ;;  %v1576_v29 = vshll.u32 %v850_v19, 8 }
  0xff   : > { %v1054_v31 = vshrl.u32 %v1053_v22, 23 }
 0x100   : > { %vm853_vm1 = vcmp.gt.s32.totalorder %v852_v18, 0  ;;  %v748_v26 = vadd.s32 1, %v1241_v20  ;;  %v1578_v30 = vshll.u32 %v746_v21, 8 }
 0x101   : > { %v854_v25 = vsel %vm853_vm1, %v852_v18, 0  ;;  %v1253_v8 = vadd.s32 4294967169, %v1054_v31 }
 0x102   : > { %v855_v27 = vshrl.u32 %v854_v25, 5  ;;  %v856_v28 = vand.u32 31, %v854_v25  ;;  %vm749_vm2 = vcmp.gt.s32.totalorder %v748_v26, 0 }
 0x103   : > { %v750_v54 = vsel %vm749_vm2, %v748_v26, 0 }
 0x104   : > { %v857_v33 = vsub.s32 32, %v856_v28  ;;  %v859_v35 = vshll.u32 %v1482_v34, %v856_v28  ;;  %v862_v37 = vshll.u32 %v1483_v36, %v856_v28  ;;  %v865_v39 = vshll.u32 %v1484_v38, %v856_v28 }
 0x105   : > { %v868_v41 = vshll.u32 %v1485_v40, %v856_v28  ;;  %v871_v43 = vshll.u32 %v1486_v42, %v856_v28  ;;  %vm874_vm3 = vcmp.lt.s32.totalorder %v855_v27, 1  ;;  %vm875_vm4 = vcmp.lt.s32.totalorder %v855_v27, 2 }
 0x106   : > { %v860_v44 = vshrl.u32 %v1483_v36, %v857_v33  ;;  %v863_v45 = vshrl.u32 %v1484_v38, %v857_v33  ;;  %v866_v46 = vshrl.u32 %v1485_v40, %v857_v33  ;;  %v858_v47 = vshrl.u32 %v1482_v34, %v857_v33 }
 0x107   : > { %v869_v48 = vshrl.u32 %v1486_v42, %v857_v33  ;;  %v872_v50 = vshrl.u32 %v1487_v49, %v857_v33  ;;  %vm876_vm5 = vcmp.lt.s32.totalorder %v855_v27, 3  ;;  %vm877_vm6 = vcmp.lt.s32.totalorder %v855_v27, 4 }
 0x108   : > { %v861_v51 = vor.u32 %v860_v44, %v859_v35  ;;  %v864_v52 = vor.u32 %v863_v45, %v862_v37  ;;  %v867_v53 = vor.u32 %v866_v46, %v865_v39  ;;  %v752_v57 = vand.u32 31, %v750_v54 }
 0x109   : > { %v870_v55 = vor.u32 %v869_v48, %v868_v41  ;;  %v873_v56 = vor.u32 %v872_v50, %v871_v43  ;;  %v751_v12 = vshrl.u32 %v750_v54, 5 }
 0x10a   : > { %v878_v58 = vsel %vm874_vm3, %v858_v47, %v861_v51  ;;  %v879_v59 = vsel %vm877_vm6, %v867_v53, 2102212464  ;;  %v882_v60 = vsel %vm874_vm3, %v861_v51, %v864_v52  ;;  %v886_v61 = vsel %vm874_vm3, %v864_v52, %v867_v53 }
 0x10b   : > { %v880_v63 = vsel %vm876_vm5, %v864_v52, %v879_v59  ;;  %v883_v0 = vsel %vm877_vm6, %v870_v55, 920167782  ;;  %v887_v1 = vsel %vm877_vm6, %v873_v56, 1326507024  ;;  %v753_v2 = vsub.s32 32, %v752_v57 }
 0x10c   : > { %v881_v4 = vsel %vm875_vm4, %v878_v58, %v880_v63  ;;  %v884_v6 = vsel %vm876_vm5, %v867_v53, %v883_v0  ;;  %v888_v7 = vsel %vm876_vm5, %v870_v55, %v887_v1  ;;  %v755_v13 = vshll.u32 %v1482_v34, %v752_v57 }
 0x10d   : > { %v885_v9 = vsel %vm875_vm4, %v882_v60, %v884_v6  ;;  %v889_v11 = vsel %vm875_vm4, %v886_v61, %v888_v7  ;;  %v897_v19 = vmul.u32 %v1576_v29, %v881_v4  ;;  %v756_v20 = vshrl.u32 %v1483_v36, %v753_v2  ;;  %v728_v6 = vpop.f32.mrf.mxu1 }
 0x10e   : > { %v1605_v15 = vmul.u32.u64.low %v1576_v29, %v889_v11  ;;  %v1606_v16 = vmul.u32.u64.high %v1576_v29, %v889_v11, %v1605_v15  ;;  %v1609_v17 = vmul.u32.u64.low %v1576_v29, %v885_v9  ;;  %v1610_v18 = vmul.u32.u64.high %v1576_v29, %v885_v9, %v1609_v17 }
 0x10f   : > { %v758_v21 = vshll.u32 %v1483_v36, %v752_v57  ;;  %v759_v22 = vshrl.u32 %v1484_v38, %v753_v2  ;;  %v761_v23 = vshll.u32 %v1484_v38, %v752_v57  ;;  %v762_v24 = vshrl.u32 %v1485_v40, %v753_v2 }
 0x110   : > { %v764_v25 = vshll.u32 %v1485_v40, %v752_v57  ;;  %v765_v26 = vshrl.u32 %v1486_v42, %v753_v2  ;;  %v757_v27 = vor.u32 %v756_v20, %v755_v13  ;;  %v767_v31 = vshll.u32 %v1486_v42, %v752_v57 }
 0x111   : > { %v760_v28 = vor.u32 %v759_v22, %v758_v21  ;;  %v768_v29 = vshrl.u32 %v1487_v49, %v753_v2  ;;  %vm899_vm7 = vc.u32 %v1606_v16, %v1609_v17  ;;  %v900_v33 = vadd.s32 1, %v1610_v18 }
 0x112   : > { %v754_v35 = vshrl.u32 %v1482_v34, %v753_v2  ;;  %v763_v37 = vor.u32 %v762_v24, %v761_v23  ;;  %v766_v39 = vor.u32 %v765_v26, %v764_v25  ;;  %vm770_vm8 = vcmp.lt.s32.totalorder %v751_v12, 1 }
 0x113   : > { %v769_v41 = vor.u32 %v768_v29, %v767_v31  ;;  %vm771_vm9 = vcmp.lt.s32.totalorder %v751_v12, 2  ;;  %v901_v43 = vsel %vm899_vm7, %v900_v33, %v1610_v18  ;;  %vm772_vm10 = vcmp.lt.s32.totalorder %v751_v12, 3 }
 0x114   : > { %vm773_vm11 = vcmp.lt.s32.totalorder %v751_v12, 4  ;;  %v778_v44 = vsel %vm770_vm8, %v757_v27, %v760_v28  ;;  %v902_v45 = vadd.s32 %v901_v43, %v897_v19  ;;  %v782_v48 = vsel %vm770_vm8, %v760_v28, %v763_v37 }
 0x115   : > { %v775_v46 = vsel %vm773_vm11, %v763_v37, 2102212464  ;;  %v779_v47 = vsel %vm773_vm11, %v766_v39, 920167782  ;;  %v774_v50 = vsel %vm770_vm8, %v754_v35, %v757_v27  ;;  %v783_v52 = vsel %vm773_vm11, %v769_v41, 1326507024 }
 0x116   : > { %v780_v51 = vsel %vm772_vm10, %v763_v37, %v779_v47  ;;  %v1060_v53 = vadd.s32 1, %v1253_v8  ;;  %v903_v54 = vadd.s32 536870912, %v902_v45  ;;  %v776_v55 = vsel %vm772_vm10, %v760_v28, %v775_v46 }
 0x117   : > { %v781_v56 = vsel %vm771_vm9, %v778_v44, %v780_v51  ;;  %v784_v57 = vsel %vm772_vm10, %v766_v39, %v783_v52  ;;  %v1050_v61 = vand.u32 2147483647, %v1571_v14  ;;  %v777_v2 = vsel %vm771_vm9, %v774_v50, %v776_v55 }
 0x118   : > { %v785_v58 = vsel %vm771_vm9, %v782_v48, %v784_v57  ;;  %v1631_v59 = vmul.u32.u64.low %v1578_v30, %v781_v56  ;;  %v1632_v60 = vmul.u32.u64.high %v1578_v30, %v781_v56, %v1631_v59  ;;  %v1636_v63 = vshrl.u32 %v903_v54, 30 }
 0x119   : > { %v1639_v0 = vmul.u32.u64.low %v1578_v30, %v785_v58  ;;  %v1640_v1 = vmul.u32.u64.high %v1578_v30, %v785_v58, %v1639_v0  ;;  %vm1061_vm12 = vcmp.gt.s32.totalorder %v1060_v53, 0  ;;  %v1645_v9 = vadd.f32 %v728_v6, %v1580_v32 }
 0x11a   : > { %v1062_v4 = vsel %vm1061_vm12, %v1060_v53, 0  ;;  %v905_v7 = vshll.u32 %v1636_v63, 30  ;;  %v796_v11 = vadd.s32 1, %v1632_v60  ;;  %v1650_v13 = vand.u32 8388607, %v1050_v61 }
 0x11b   : > { %v1064_v8 = vand.u32 31, %v1062_v4  ;;  %v793_v18 = vmul.u32 %v1578_v30, %v777_v2  ;;  %vm795_vm13 = vc.u32 %v1640_v1, %v1631_v59  ;;  %v949_v32 = vand.u32 2139095040, %v1645_v9 }
 0x11c   : > { %v906_v15 = vsub.s32 %v902_v45, %v905_v7  ;;  %v797_v12 = vsel %vm795_vm13, %v796_v11, %v1632_v60  ;;  %v1058_v22 = vor.u32 8388608, %v1650_v13  ;;  %v898_v30 = vadd.s32 %v1609_v17, %v1606_v16 }
 0x11d   : > { %v1065_v19 = vsub.s32 32, %v1064_v8  ;;  %v798_v21 = vadd.s32 %v797_v12, %v793_v18  ;;  %v1063_v27 = vshrl.u32 %v1062_v4, 5  ;;  %v1073_v31 = vshll.u32 %v1484_v38, %v1064_v8 }
 0x11e   : > { %v908_v20 = vsub.s32 0, %v906_v15  ;;  %v1067_v33 = vshll.u32 %v1482_v34, %v1064_v8  ;;  %v950_v37 = vshrl.u32 %v949_v32, 23  ;;  %v928_v39 = vsub.s32 4, %v1636_v63 }
 0x11f   : > { %v799_v24 = vadd.s32 536870912, %v798_v21  ;;  %v1068_v25 = vshrl.u32 %v1483_v36, %v1065_v19  ;;  %v1074_v26 = vshrl.u32 %v1485_v40, %v1065_v19  ;;  %v1071_v28 = vshrl.u32 %v1484_v38, %v1065_v19 }
 0x120   : > { %v1246_v23 = vmin.u32 %v908_v20, %v906_v15  ;;  %v1077_v35 = vshrl.u32 %v1486_v42, %v1065_v19  ;;  %v1070_v43 = vshll.u32 %v1483_v36, %v1064_v8  ;;  %v1076_v17 = vshll.u32 %v1485_v40, %v1064_v8 }
 0x121   : > { %v1667_v41 = vshrl.u32 %v799_v24, 30  ;;  %v1075_v44 = vor.u32 %v1074_v26, %v1073_v31  ;;  %v1069_v16 = vor.u32 %v1068_v25, %v1067_v33  ;;  %v1080_v46 = vshrl.u32 %v1487_v49, %v1065_v19 }
 0x122   : > { %v910_v29 = vclz %v1246_v23  ;;  %v1072_v48 = vor.u32 %v1071_v28, %v1070_v43  ;;  %v1079_v50 = vshll.u32 %v1486_v42, %v1064_v8  ;;  %vm1085_vm14 = vcmp.lt.s32.totalorder %v1063_v27, 4 }
 0x123   : > { %v801_v47 = vshll.u32 %v1667_v41, 30  ;;  %v1078_v51 = vor.u32 %v1077_v35, %v1076_v17  ;;  %v1087_v52 = vsel %vm1085_vm14, %v1075_v44, 2102212464  ;;  %v1249_v53 = vadd.s32 4294967169, %v950_v37 }
 0x124   : > { %v1247_v45 = vadd.s32 4294967294, %v910_v29  ;;  %v1066_v56 = vshrl.u32 %v1482_v34, %v1065_v19  ;;  %v1081_v57 = vor.u32 %v1080_v46, %v1079_v50  ;;  %vm1082_vm0 = vcmp.lt.s32.totalorder %v1063_v27, 1 }
 0x125   : > { %v1675_v55 = vsub.s32 %v798_v21, %v801_v47  ;;  %vm1084_vm1 = vcmp.lt.s32.totalorder %v1063_v27, 3  ;;  %v1090_v11 = vsel %vm1082_vm0, %v1069_v16, %v1072_v48  ;;  %v1091_v13 = vsel %vm1085_vm14, %v1078_v51, 920167782 }
 0x126   : > { %vm1248_vm15 = vcmp.lt.s32.totalorder %v1247_v45, 0  ;;  %v1086_v4 = vsel %vm1082_vm0, %v1066_v56, %v1069_v16  ;;  %v1088_v6 = vsel %vm1084_vm1, %v1072_v48, %v1087_v52  ;;  %v1092_v12 = vsel %vm1084_vm1, %v1075_v44, %v1091_v13 }
 0x127   : > { %v913_v54 = vsel %vm1248_vm15, 0, %v1247_v45  ;;  %v804_v2 = vsub.s32 0, %v1675_v55  ;;  %v1094_v19 = vsel %vm1082_vm0, %v1072_v48, %v1075_v44  ;;  %v1095_v20 = vsel %vm1085_vm14, %v1081_v57, 1326507024 }
 0x128   : > { %v914_v58 = vsub.s32 32, %v913_v54  ;;  %v918_v60 = vsub.s32 4294967266, %v913_v54  ;;  %v915_v0 = vshll.u32 %v906_v15, %v913_v54  ;;  %vm1083_vm2 = vcmp.lt.s32.totalorder %v1063_v27, 2 }
 0x129   : > { %v1242_v18 = vmin.u32 %v804_v2, %v1675_v55  ;;  %v1096_v15 = vsel %vm1084_vm1, %v1078_v51, %v1095_v20  ;;  %vm844_vm3 = vcmp.lt.s32.totalorder %v1561_v62, 0  ;;  %v1093_v24 = vsel %vm1083_vm2, %v1090_v11, %v1092_v12 }
 0x12a   : > { %v916_v7 = vshrl.u32 %v898_v30, %v914_v58  ;;  %v919_v8 = vadd.s32 127, %v918_v60  ;;  %v1098_v25 = vshll.u32 %v1058_v22, 8  ;;  %v929_v30 = vsel %vm844_vm3, %v928_v39, %v1636_v63 }
 0x12b   : > { %v806_v23 = vclz %v1242_v18  ;;  %v1089_v28 = vsel %vm1083_vm2, %v1086_v4, %v1088_v6  ;;  %v1097_v31 = vsel %vm1083_vm2, %v1094_v19, %v1096_v15  ;;  %v956_v45 = vadd.s32 1, %v1249_v53 }
 0x12c   : > { %v917_v21 = vor.u32 %v916_v7, %v915_v0  ;;  %v920_v32 = vshll.u32 %v919_v8, 23  ;;  %v1689_v35 = vmul.u32.u64.low %v1098_v25, %v1097_v31  ;;  %v1690_v37 = vmul.u32.u64.high %v1098_v25, %v1097_v31, %v1689_v35 }
 0x12d   : > { %v1243_v33 = vadd.s32 4294967294, %v806_v23  ;;  %v1692_v27 = vmul.u32.u64.low %v1098_v25, %v1093_v24  ;;  %v1693_v44 = vmul.u32.u64.high %v1098_v25, %v1093_v24, %v1692_v27  ;;  %vm1698_vm4 = vcmp.le.f32.partialorder %v842_v3, 0.7853982 }
 0x12e   : > { %v921_v26 = vor.u32 4788187, %v920_v32  ;;  %v924_v29 = vcvt.s32.f32 %v917_v21  ;;  %v946_v63 = vand.u32 2147483647, %v1645_v9  ;;  %v794_v16 = vadd.s32 %v1631_v59, %v1640_v1 }
 0x12f   : > { %vm1244_vm5 = vcmp.lt.s32.totalorder %v1243_v33, 0  ;;  %vm957_vm6 = vcmp.gt.s32.totalorder %v956_v45, 0  ;;  %v931_v46 = vsel %vm1698_vm4, 0, %v929_v30  ;;  %v1105_v50 = vmul.u32 %v1098_v25, %v1089_v28 }
 0x130   : > { %v922_v43 = vand.u32 2147483647, %v921_v26  ;;  %v809_v17 = vsel %vm1244_vm5, 0, %v1243_v33  ;;  %vm1107_vm7 = vc.u32 %v1690_v37, %v1692_v27  ;;  %v1108_v3 = vadd.s32 1, %v1693_v44 }
 0x131   : > { %v810_v47 = vsub.s32 32, %v809_v17  ;;  %v814_v48 = vsub.s32 4294967266, %v809_v17  ;;  %v958_v52 = vsel %vm957_vm6, %v956_v45, 0  ;;  %v811_v53 = vshll.u32 %v1675_v55, %v809_v17 }
 0x132   : > { %v925_v39 = vmul.f32 %v924_v29, %v922_v43  ;;  %v960_v59 = vand.u32 31, %v958_v52  ;;  %v935_v57 = vadd.s32 3, %v931_v46  ;;  %v824_v58 = vsub.s32 4, %v1667_v41 }
 0x133   : > { %v812_v54 = vshrl.u32 %v794_v16, %v810_v47  ;;  %v815_v56 = vadd.s32 127, %v814_v48  ;;  %v1109_v60 = vsel %vm1107_vm7, %v1108_v3, %v1693_v44  ;;  %vm740_vm8 = vcmp.lt.s32.totalorder %v1565_v5, 0 }
 0x134   : > { %v926_v51 = vxor.u32 2147483648, %v925_v39  ;;  %v1110_v6 = vadd.s32 %v1109_v60, %v1105_v50  ;;  %v961_v55 = vsub.s32 32, %v960_v59  ;;  %vm1721_vm9 = vcmp.le.f32.partialorder %v738_v10, 0.7853982 }
 0x135   : > { %v813_v2 = vor.u32 %v812_v54, %v811_v53  ;;  %v816_v4 = vshll.u32 %v815_v56, 23  ;;  %v1725_v13 = vand.u32 3, %v935_v57  ;;  %v1730_v12 = vsel %vm740_vm8, %v824_v58, %v1667_v41 }
 0x136   : > { %v927_v1 = vsel %vm844_vm3, %v926_v51, %v925_v39  ;;  %v1111_v11 = vadd.s32 536870912, %v1110_v6  ;;  %v953_v19 = vand.u32 8388607, %v946_v63  ;;  %v964_v10 = vshrl.u32 %v1483_v36, %v961_v55 }
 0x137   : > { %v930_v0 = vsel %vm1698_vm4, %v1561_v62, %v927_v1  ;;  %v817_v8 = vor.u32 4788187, %v816_v4  ;;  %v820_v18 = vcvt.s32.f32 %v813_v2  ;;  %v967_v32 = vshrl.u32 %v1484_v38, %v961_v55 }
 0x138   : > { %1404 = vcosq.f32 %v930_v0  ;;  %v1734_v21 = vshrl.u32 %v1111_v11, 30  ;;  %v1738_v15 = vshrl.u32 %v958_v52, 5  ;;  %v970_v23 = vshrl.u32 %v1485_v40, %v961_v55 }
 0x139   : > { %1406 = vsinq.f32 %v930_v0  ;;  %v818_v20 = vand.u32 2147483647, %v817_v8  ;;  %v972_v24 = vshll.u32 %v1485_v40, %v960_v59  ;;  %v973_v25 = vshrl.u32 %v1486_v42, %v961_v55 }
 0x13a   : > { %v1113_v26 = vshll.u32 %v1734_v21, 30  ;;  %v963_v30 = vshll.u32 %v1482_v34, %v960_v59  ;;  %v966_v28 = vshll.u32 %v1483_v36, %v960_v59  ;;  %v969_v31 = vshll.u32 %v1484_v38, %v960_v59 }
 0x13b   : > { %v821_v41 = vmul.f32 %v820_v18, %v818_v20  ;;  %v974_v29 = vor.u32 %v973_v25, %v972_v24  ;;  %v975_v33 = vshll.u32 %v1486_v42, %v960_v59  ;;  %v976_v35 = vshrl.u32 %v1487_v49, %v961_v55 }
 0x13c   : > { %v1749_v44 = vsub.s32 %v1110_v6, %v1113_v26  ;;  %v965_v40 = vor.u32 %v964_v10, %v963_v30  ;;  %v968_v45 = vor.u32 %v967_v32, %v966_v28  ;;  %vm938_vm10 = vcmp.eq.s32.totalorder %v1725_v13, 0 }
 0x13d   : > { %v822_v43 = vxor.u32 2147483648, %v821_v41  ;;  %vm941_vm11 = vcmp.eq.s32.totalorder %v1725_v13, 2  ;;  %v971_v22 = vor.u32 %v970_v23, %v969_v31  ;;  %v977_v39 = vor.u32 %v976_v35, %v975_v33 }
 0x13e   : > { %vm937_vm12 = vcmp.lt.s32.totalorder %v1725_v13, 2  ;;  %v827_v38 = vsel %vm1721_vm9, 0, %v1730_v12  ;;  %v1116_v42 = vsub.s32 0, %v1749_v44  ;;  %vm981_vm13 = vcmp.lt.s32.totalorder %v1738_v15, 4 }
 0x13f   : > { %v823_v36 = vsel %vm740_vm8, %v822_v43, %v821_v41  ;;  %vm934_vm14 = vweird.f32 %v1561_v62  ;;  %v954_v16 = vor.u32 8388608, %v953_v19  ;;  %vm978_vm15 = vcmp.lt.s32.totalorder %v1738_v15, 1 }
 0x140   : > { %v826_v49 = vsel %vm1721_vm9, %v1565_v5, %v823_v36  ;;  %v987_v17 = vsel %vm981_vm13, %v974_v29, 920167782  ;;  %v1254_v46 = vmin.u32 %v1116_v42, %v1749_v44  ;;  %vm980_vm0 = vcmp.lt.s32.totalorder %v1738_v15, 3 }
 0x141   : > { %1408 = vcosq.f32 %v826_v49  ;;  %v986_v47 = vsel %vm978_vm15, %v965_v40, %v968_v45  ;;  %v988_v48 = vsel %vm980_vm0, %v971_v22, %v987_v17  ;;  %v990_v50 = vsel %vm978_vm15, %v968_v45, %v971_v22 }
 0x142   : > { %1410 = vsinq.f32 %v826_v49  ;;  %v991_v51 = vsel %vm981_vm13, %v977_v39, 1326507024  ;;  %v1118_v52 = vclz %v1254_v46  ;;  %v962_v53 = vshrl.u32 %v1482_v34, %v961_v55 }
 0x143   : > { %vm979_vm1 = vcmp.lt.s32.totalorder %v1738_v15, 2  ;;  %v983_v54 = vsel %vm981_vm13, %v971_v22, 2102212464  ;;  %v992_v57 = vsel %vm980_vm0, %v974_v29, %v991_v51  ;;  %v994_v58 = vshll.u32 %v954_v16, 8 }
 0x144   : > { %v989_v1 = vsel %vm979_vm1, %v986_v47, %v988_v48  ;;  %v1255_v0 = vadd.s32 4294967294, %v1118_v52  ;;  %v982_v34 = vsel %vm978_vm15, %v962_v53, %v965_v40  ;;  %v993_v2 = vsel %vm979_vm1, %v990_v50, %v992_v57 }
 0x145   : > { %v1405_v3 = vpop.eup %1404  ;;  %v984_v6 = vsel %vm980_vm0, %v968_v45, %v983_v54  ;;  %v1797_v55 = vmul.u32.u64.low %v994_v58, %v993_v2  ;;  %v1798_v7 = vmul.u32.u64.high %v994_v58, %v993_v2, %v1797_v55  ;;  %v831_v19 = vadd.s32 3, %v827_v38 }
 0x146   : > { %v1407_v56 = vpop.eup %1406  ;;  %v942_v59 = vxor.u32 2147483648, %v1405_v3  ;;  %vm1256_vm2 = vcmp.lt.s32.totalorder %v1255_v0, 0  ;;  %v1802_v11 = vmul.u32.u64.low %v994_v58, %v989_v1  ;;  %v1803_v18 = vmul.u32.u64.high %v994_v58, %v989_v1, %v1802_v11 }
 0x147   : > { %v939_v60 = vxor.u32 2147483648, %v1407_v56  ;;  %v1106_v20 = vadd.s32 %v1692_v27, %v1690_v37  ;;  %v1121_v10 = vsel %vm1256_vm2, 0, %v1255_v0  ;;  %v985_v25 = vsel %vm979_vm1, %v982_v34, %v984_v6 }
 0x148   : > { %v943_v4 = vsel %vm941_vm11, %v942_v59, %v1407_v56  ;;  %v1122_v23 = vsub.s32 32, %v1121_v10  ;;  %v1126_v24 = vsub.s32 4294967266, %v1121_v10  ;;  %vm1003_vm3 = vc.u32 %v1798_v7, %v1802_v11 }
 0x149   : > { %v940_v8 = vsel %vm938_vm10, %v1405_v3, %v939_v60  ;;  %v1123_v13 = vshll.u32 %v1749_v44, %v1121_v10  ;;  %v1004_v37 = vadd.s32 1, %v1803_v18  ;;  %v832_v27 = vand.u32 3, %v831_v19 }
 0x14a   : > { %v944_v12 = vsel %vm937_vm12, %v940_v8, %v943_v4  ;;  %v1124_v41 = vshrl.u32 %v1106_v20, %v1122_v23  ;;  %v1127_v26 = vadd.s32 127, %v1126_v24  ;;  %v1001_v62 = vmul.u32 %v994_v58, %v985_v25 }
 0x14b   : > { %v945_v32 = vsel %vm934_vm14, nan, %v944_v12  ;;  %v1005_v31 = vsel %vm1003_vm3, %v1004_v37, %v1803_v18  ;;  %vm837_vm4 = vcmp.eq.s32.totalorder %v832_v27, 2  ;;  %vm834_vm5 = vcmp.eq.s32.totalorder %v832_v27, 0 }
 0x14c   : > { %1155 = vst [vmem:[%s1813_s30 + $0x8] sm:$0xff] %v945_v32  ;;  %v1125_v30 = vor.u32 %v1124_v41, %v1123_v13  ;;  %v1128_v28 = vshll.u32 %v1127_v26, 23  ;;  %v1006_v29 = vadd.s32 %v1005_v31, %v1001_v62  ;;  %vm833_vm6 = vcmp.lt.s32.totalorder %v832_v27, 2 }
 0x14d   : > { %vm830_vm7 = vweird.f32 %v1565_v5  ;;  %vm1052_vm8 = vcmp.lt.s32.totalorder %v1571_v14, 0  ;;  %v1136_v47 = vsub.s32 4, %v1734_v21  ;;  %vm1051_vm9 = vcmp.le.f32.partialorder %v1050_v61, 0.7853982 }
 0x14e   : > { %v1409_v15 = vpop.eup %1408  ;;  %v1129_v43 = vor.u32 4788187, %v1128_v28  ;;  %v1007_v45 = vadd.s32 536870912, %v1006_v29  ;;  %v1132_v39 = vcvt.s32.f32 %v1125_v30  ;;  %v1002_v57 = vadd.s32 %v1802_v11, %v1798_v7 }
 0x14f   : > { %v1411_v33 = vpop.eup %1410  ;;  %v838_v35 = vxor.u32 2147483648, %v1409_v15  ;;  %v1137_v5 = vsel %vm1052_vm8, %v1136_v47, %v1734_v21  ;;  %vm1142_vm14 = vweird.f32 %v1571_v14  ;;  %vm948_vm15 = vcmp.lt.s32.totalorder %v1645_v9, 0 }
 0x150   : > { %v835_v40 = vxor.u32 2147483648, %v1411_v33  ;;  %v1130_v22 = vand.u32 2147483647, %v1129_v43  ;;  %v1008_v38 = vshrl.u32 %v1007_v45, 30  ;;  %v1139_v54 = vsel %vm1051_vm9, 0, %v1137_v5 }
 0x151   : > { %v839_v44 = vsel %vm837_vm4, %v838_v35, %v1411_v33  ;;  %v1143_v59 = vadd.s32 3, %v1139_v54  ;;  %vm947_vm0 = vcmp.le.f32.partialorder %v946_v63, 0.7853982  ;;  %vm1038_vm4 = vweird.f32 %v1645_v9 }
 0x152   : > { %v836_v36 = vsel %vm834_vm5, %v1409_v15, %v835_v40  ;;  %v1133_v49 = vmul.f32 %v1132_v39, %v1130_v22  ;;  %v1009_v17 = vshll.u32 %v1008_v38, 30  ;;  %v1032_v25 = vsub.s32 4, %v1008_v38 }
 0x153   : > { %v840_v42 = vsel %vm833_vm6, %v836_v36, %v839_v44  ;;  %v1144_v61 = vand.u32 3, %v1143_v59 }
 0x154   : > { %v841_v16 = vsel %vm830_vm7, nan, %v840_v42  ;;  %v1134_v46 = vxor.u32 2147483648, %v1133_v49  ;;  %v1010_v48 = vsub.s32 %v1006_v29, %v1009_v17  ;;  %v1033_v26 = vsel %vm948_vm15, %v1032_v25, %v1008_v38 }
 0x155   : > { %1154 = vst [vmem:[%s1813_s30] sm:$0xff] %v841_v16  ;;  %vm1149_vm11 = vcmp.eq.s32.totalorder %v1144_v61, 2  ;;  %vm1146_vm12 = vcmp.eq.s32.totalorder %v1144_v61, 0  ;;  %vm1145_vm13 = vcmp.lt.s32.totalorder %v1144_v61, 2 }
 0x156   : > { %v1135_v50 = vsel %vm1052_vm8, %v1134_v46, %v1133_v49  ;;  %v1012_v3 = vsub.s32 0, %v1010_v48 }
 0x157   : > { %v1138_v51 = vsel %vm1051_vm9, %v1571_v14, %v1135_v50  ;;  %v1035_v14 = vsel %vm947_vm0, 0, %v1033_v26 }
 0x158   : > { %1412 = vcosq.f32 %v1138_v51  ;;  %v1250_v52 = vmin.u32 %v1012_v3, %v1010_v48  ;;  %v1039_v37 = vadd.s32 3, %v1035_v14 }
 0x159   : > { %1414 = vsinq.f32 %v1138_v51 }
 0x15a   : > { %v1014_v53 = vclz %v1250_v52  ;;  %v1040_v27 = vand.u32 3, %v1039_v37 }
 0x15c   : > { %v1251_v56 = vadd.s32 4294967294, %v1014_v53  ;;  %vm1045_vm1 = vcmp.eq.s32.totalorder %v1040_v27, 2  ;;  %vm1042_vm2 = vcmp.eq.s32.totalorder %v1040_v27, 0  ;;  %vm1041_vm3 = vcmp.lt.s32.totalorder %v1040_v27, 2 }
 0x15e   : > { %vm1252_vm10 = vcmp.lt.s32.totalorder %v1251_v56, 0 }
 0x15f   : > { %v1017_v1 = vsel %vm1252_vm10, 0, %v1251_v56 }
 0x160   : > { %v1018_v58 = vsub.s32 32, %v1017_v1  ;;  %v1022_v60 = vsub.s32 4294967266, %v1017_v1  ;;  %v1019_v0 = vshll.u32 %v1010_v48, %v1017_v1 }
 0x162   : > { %v1020_v34 = vshrl.u32 %v1002_v57, %v1018_v58  ;;  %v1023_v2 = vadd.s32 127, %v1022_v60 }
 0x164   : > { %v1021_v6 = vor.u32 %v1020_v34, %v1019_v0  ;;  %v1024_v55 = vshll.u32 %v1023_v2, 23 }
 0x165   : > { %v1413_v4 = vpop.eup %1412 }
 0x166   : > { %v1415_v21 = vpop.eup %1414  ;;  %v1150_v8 = vxor.u32 2147483648, %v1413_v4  ;;  %v1025_v12 = vor.u32 4788187, %v1024_v55  ;;  %v1028_v11 = vcvt.s32.f32 %v1021_v6 }
 0x167   : > { %v1147_v18 = vxor.u32 2147483648, %v1415_v21 }
 0x168   : > { %v1151_v19 = vsel %vm1149_vm11, %v1150_v8, %v1415_v21  ;;  %v1026_v7 = vand.u32 2147483647, %v1025_v12 }
 0x169   : > { %v1148_v20 = vsel %vm1146_vm12, %v1413_v4, %v1147_v18 }
 0x16a   : > { %v1152_v10 = vsel %vm1145_vm13, %v1148_v20, %v1151_v19  ;;  %v1029_v23 = vmul.f32 %v1028_v11, %v1026_v7 }
 0x16b   : > { %v1153_v32 = vsel %vm1142_vm14, nan, %v1152_v10 }
 0x16c   : > { %1157 = vst [vmem:[%s1813_s30 + $0x18] sm:$0xff] %v1153_v32  ;;  %v1030_v24 = vxor.u32 2147483648, %v1029_v23 }
 0x16e   : > { %v1031_v13 = vsel %vm948_vm15, %v1030_v24, %v1029_v23 }
 0x16f   : > { %v1034_v41 = vsel %vm947_vm0, %v1645_v9, %v1031_v13 }
 0x170   : > { %1416 = vcosq.f32 %v1034_v41 }
 0x171   : > { %1418 = vsinq.f32 %v1034_v41 }
 0x17d   : > { %v1417_v62 = vpop.eup %1416 }
 0x17e   : > { %v1419_v30 = vpop.eup %1418  ;;  %v1046_v28 = vxor.u32 2147483648, %v1417_v62 }
 0x17f   : > { %v1043_v31 = vxor.u32 2147483648, %v1419_v30 }
 0x180   : > { %v1047_v63 = vsel %vm1045_vm1, %v1046_v28, %v1419_v30 }
 0x181   : > { %v1044_v15 = vsel %vm1042_vm2, %v1417_v62, %v1043_v31 }
 0x182   : > { %v1048_v29 = vsel %vm1041_vm3, %v1044_v15, %v1047_v63 }
 0x183   : > { %v1049_v33 = vsel %vm1038_vm4, nan, %v1048_v29 }
 0x184   : > { %1156 = vst [vmem:[%s1813_s30 + $0x10] sm:$0xff] %v1049_v33 }
 0x185   : > { %1433 = shalt.err (!%p1430_p3)
}
 0x186   : > { %s1434_s21 = scalar_lea.hbm %s1840_s7, 512  ;;  %s1438_s24 = scalar_lea.hbm %s1890_s2, 1024 }
 0x187   : > { %p1435_p4 = scmp.ne.s32.totalorder %s1840_s7, %s1434_s21  ;;  %p1439_p9 = scmp.lt.s32.totalorder %s1840_s7, %s1890_s2 }
 0x188   : > { %p1440_p10 = scmp.lt.s32.totalorder %s1438_s24, %s1434_s21 }
 0x189   : > { %p1436_p7 = pnand %p1435_p4, %p1544_p5 }
 0x18a   : > { %p1441_p11 = por %p1440_p10, %p1439_p9 }
 0x18b   : > { %p1437_p8 = pneg %p1436_p7 }
 0x18d   : > { %p1442_p12 = pnand %p1441_p11, %p1437_p8 }
 0x18f   : > { %1445 = shalt.err (!%p1442_p12)
}
 0x190   : > { %s1489_s27 = smov 128   ;;  %s1490_s28 = smov 8  }
 0x191   : > { %1357 = dma.vmem_to_hbm [thread:$0]  (%p1544_p5), %s1842_s4, 512, %s1840_s7, %s1848_s8, %s1489_s27, %s1489_s27, %s1490_s28  }
 0x192 PF: > { %p1363_p13 = scmp.ge.s32.totalorder %s1480_s12, 2  ;;  %s1187_s29 = sand.u32 1, %s1468_s9  }
 0x193   : > { %s1188_s30 = scalar_lea.sflag [#allocation3], %s1187_s29 }
 0x194   : > { %p1360_p0 = pnand %p1363_p13, %p1548_p6 }
 0x196   : > { %p1361_p1 = pneg %p1360_p0 }
 0x198   : > { %1463 = dma.done.wait (%p1361_p1), %s1188_s30, 512  }
 0x199   : > { %1465 = vsyncadd (%p1361_p1), %s1188_s30, 4294966784  ;;  %p12_p2 = scmp.ge.s32.totalorder %s1531_s15, 4   ;;  %s1897_s9 = smov %s1472_s10 }
 0x19a   : > { %s1898_s10 = smov %s1476_s11  ;;  %s1899_s11 = smov %s1542_s18 }
 0x19b   : > { %s1900_s12 = smov %s1531_s15  ;;  %14 = sbr.rel (!%p12_p2) target bundleno = 3 (0x3), region = 63 }
 0x1a0   :  { %1193 = vsyncpa [#allocation3], 1 }
 0x1a1   :  { %1195 = vsyncpa [#allocation3 + $0x1], 1 }

</bundles_post_ra>
